<compile_context>
chip_gen: v6e
topology: v6e:2x2x1
jax: 0.10.0
libtpu: 0.0.40
codegen_flags: <defaults>
</compile_context>

<pallas_src>
import functools

import jax
import jax.numpy as jnp
from jax.experimental import pallas as pl
from jax.experimental.pallas import tpu as pltpu


def _log_sigmoid(x):
    # Inputs are pre-clamped to [-10, 10], so the naive form is safe in f32.
    return -jnp.log1p(jnp.exp(-x))


def _skipgram_hs_tile_kernel(wg_ref, vg_ref, sign_ref, out_ref):
    """One tile of pairs.

    wg_ref / vg_ref : [embed, TILE]  gathered embeddings, pairs on lane axis.
    sign_ref        : [1, TILE]      +1 for positive pairs, -1 for negative,
                                     0 for padding.
    out_ref         : [8, 128]       per-tile partial-sum slab (scalar at
                                     [0, 0], zeros elsewhere).
    """
    prod = wg_ref[...] * vg_ref[...]                       # VPU, lane-dense
    s = jnp.sum(prod, axis=0, keepdims=True)               # [1, TILE] sublane reduce
    s = jnp.clip(s, -10.0, 10.0)

    sign = sign_ref[...]                                   # [1, TILE]
    z = sign * s                                           # logsigmoid(sign * s)
    term = _log_sigmoid(z)
    term = term * jnp.abs(sign)                            # zero out padded pairs

    partial = jnp.sum(term)                                # this tile's partial sum

    row = jax.lax.broadcasted_iota(jnp.int32, (8, 128), 0)
    col = jax.lax.broadcasted_iota(jnp.int32, (8, 128), 1)
    out_ref[...] = jnp.where((row == 0) & (col == 0), partial, 0.0)


def skipgram_hs_forward(w_emb, v_emb, pos_w, pos_v, neg_w, neg_v, *,
                        pair_tile=1024):
    """Pallas implementation of SkipGramHSModel.forward.

    w_emb, v_emb : (2*vocab_size - 1, embed_size) float32 embedding tables.
    pos_w/pos_v  : int32 index vectors of length Np.
    neg_w/neg_v  : int32 index vectors of length Nn.
    Returns scalar float32 loss.
    """
    embed = w_emb.shape[1]
    n_pos = pos_w.shape[0]
    n_neg = neg_w.shape[0]
    n = n_pos + n_neg

    # Merge pos/neg into one pair stream + per-pair sign.
    idx_w = jnp.concatenate([pos_w, neg_w]).astype(jnp.int32)
    idx_v = jnp.concatenate([pos_v, neg_v]).astype(jnp.int32)
    sign = jnp.concatenate([jnp.ones((n_pos,), jnp.float32),
                            -jnp.ones((n_neg,), jnp.float32)])

    # Pad the pair axis up to a multiple of the tile (padding has sign == 0).
    num_tiles = pl.cdiv(n, pair_tile)
    n_pad = num_tiles * pair_tile
    pad = n_pad - n
    idx_w = jnp.pad(idx_w, (0, pad))
    idx_v = jnp.pad(idx_v, (0, pad))
    sign = jnp.pad(sign, (0, pad))

    # Embedding lookup (nn.Embedding) + transpose so pairs land on the lane
    # axis.  See TODO(synk) at the top about fusing this into the kernel.
    wg = jnp.take(w_emb, idx_w, axis=0).T                  # [embed, n_pad]
    vg = jnp.take(v_emb, idx_v, axis=0).T                  # [embed, n_pad]
    sign2 = sign.reshape(1, n_pad)                         # [1, n_pad]

    partials = pl.pallas_call(
        _skipgram_hs_tile_kernel,
        out_shape=jax.ShapeDtypeStruct((num_tiles * 8, 128), jnp.float32),
        grid=(num_tiles,),
        in_specs=[
            pl.BlockSpec((embed, pair_tile), lambda i: (0, i)),
            pl.BlockSpec((embed, pair_tile), lambda i: (0, i)),
            pl.BlockSpec((1, pair_tile), lambda i: (0, i)),
        ],
        out_specs=pl.BlockSpec((8, 128), lambda i: (i, 0)),
        compiler_params=pltpu.CompilerParams(
            dimension_semantics=("parallel",),
        ),
    )(wg, vg, sign2)

    # loss = -(score1.sum() + score2.sum()).mean()  (mean of a scalar == id)
    return -jnp.sum(partials)


def reference_forward(w_emb, v_emb, pos_w, pos_v, neg_w, neg_v):
    """Pure-JAX reference matching the PyTorch forward."""
    pw = jnp.take(w_emb, pos_w, axis=0)
    pv = jnp.take(v_emb, pos_v, axis=0)
    nw = jnp.take(w_emb, neg_w, axis=0)
    nv = jnp.take(v_emb, neg_v, axis=0)
    s1 = _log_sigmoid(jnp.clip(jnp.sum(pw * pv, axis=1), -10.0, 10.0))
    s2 = _log_sigmoid(-jnp.clip(jnp.sum(nw * nv, axis=1), -10.0, 10.0))
    return -(jnp.sum(s1) + jnp.sum(s2))


if __name__ == "__main__":
    vocab_size = 500
    embed_size = 32
    table_rows = 2 * vocab_size - 1       # words + inner Huffman-tree nodes
    n_pos = 700
    n_neg = 612
    pair_tile = 512                        # small demo tile (>= 512 pairs/row)

    key = jax.random.PRNGKey(0)
    k_w, k_v, k_pw, k_pv, k_nw, k_nv = jax.random.split(key, 6)

    # Deterministic synthetic parameter init (stands in for nn.Embedding init).
    w_emb = jax.random.normal(k_w, (table_rows, embed_size), dtype=jnp.float32)
    v_emb = jax.random.normal(k_v, (table_rows, embed_size), dtype=jnp.float32) * 0.1

    pos_w = jax.random.randint(k_pw, (n_pos,), 0, table_rows, dtype=jnp.int32)
    pos_v = jax.random.randint(k_pv, (n_pos,), 0, table_rows, dtype=jnp.int32)
    neg_w = jax.random.randint(k_nw, (n_neg,), 0, table_rows, dtype=jnp.int32)
    neg_v = jax.random.randint(k_nv, (n_neg,), 0, table_rows, dtype=jnp.int32)

    fwd = jax.jit(functools.partial(skipgram_hs_forward, pair_tile=pair_tile))
    loss = fwd(w_emb, v_emb, pos_w, pos_v, neg_w, neg_v)
    loss = jax.block_until_ready(loss)

    ref = reference_forward(w_emb, v_emb, pos_w, pos_v, neg_w, neg_v)
    assert jnp.allclose(loss, ref, rtol=1e-4, atol=1e-4), (loss, ref)

    print("KERNEL_OK")
</pallas_src>

<mosaic_0001>
module attributes {stable_mosaic.version = 11 : i64} {
  func.func @_skipgram_hs_tile_kernel(%arg0: i32, %arg1: memref<32x512xf32, #tpu.memory_space<vmem>>, %arg2: memref<32x512xf32, #tpu.memory_space<vmem>>, %arg3: memref<1x512xf32, #tpu.memory_space<vmem>>, %arg4: memref<8x128xf32, #tpu.memory_space<vmem>>) attributes {dimension_semantics = [#tpu.dimension_semantics<parallel>], iteration_bounds = array<i64: 3>, scalar_prefetch = 0 : i64, scratch_operands = 0 : i64, tpu.core_type = #tpu.core_type<tc>, window_params = [{transform_indices = @transform_0, window_bounds = array<i64: 32, 512>}, {transform_indices = @transform_1, window_bounds = array<i64: 32, 512>}, {transform_indices = @transform_2, window_bounds = array<i64: 1, 512>}, {transform_indices = @transform_3, window_bounds = array<i64: 8, 128>}]} {
    %c0 = arith.constant 0 : index
    %c0_0 = arith.constant 0 : index
    %0 = vector.load %arg1[%c0, %c0_0] : memref<32x512xf32, #tpu.memory_space<vmem>>, vector<32x512xf32>
    %c0_1 = arith.constant 0 : index
    %c0_2 = arith.constant 0 : index
    %1 = vector.load %arg2[%c0_1, %c0_2] : memref<32x512xf32, #tpu.memory_space<vmem>>, vector<32x512xf32>
    %2 = arith.mulf %0, %1 : vector<32x512xf32>
    %cst = arith.constant dense<0.000000e+00> : vector<512xf32>
    %3 = vector.multi_reduction <add>, %2, %cst [0] : vector<32x512xf32> to vector<512xf32>
    %4 = vector.shape_cast %3 : vector<512xf32> to vector<1x512xf32>
    %cst_3 = arith.constant -1.000000e+01 : f32
    %cst_4 = arith.constant 1.000000e+01 : f32
    %5 = vector.broadcast %cst_3 : f32 to vector<1x512xf32>
    %6 = arith.maximumf %5, %4 : vector<1x512xf32>
    %7 = vector.broadcast %cst_4 : f32 to vector<1x512xf32>
    %8 = arith.minimumf %7, %6 : vector<1x512xf32>
    %c0_5 = arith.constant 0 : index
    %c0_6 = arith.constant 0 : index
    %9 = vector.load %arg3[%c0_5, %c0_6] : memref<1x512xf32, #tpu.memory_space<vmem>>, vector<1x512xf32>
    %10 = arith.mulf %9, %8 : vector<1x512xf32>
    %cst_7 = arith.constant 0.000000e+00 : f32
    %11 = vector.broadcast %cst_7 : f32 to vector<1x512xf32>
    %12 = arith.subf %11, %10 : vector<1x512xf32>
    %13 = math.exp %12 : vector<1x512xf32>
    %14 = math.log1p %13 : vector<1x512xf32>
    %cst_8 = arith.constant 0.000000e+00 : f32
    %15 = vector.broadcast %cst_8 : f32 to vector<1x512xf32>
    %16 = arith.subf %15, %14 : vector<1x512xf32>
    %17 = math.absf %9 : vector<1x512xf32>
    %18 = arith.mulf %16, %17 : vector<1x512xf32>
    %19 = vector.shape_cast %18 : vector<1x512xf32> to vector<1x1x512xf32>
    %cst_9 = arith.constant dense<0.000000e+00> : vector<1xf32>
    %20 = vector.multi_reduction <add>, %19, %cst_9 [1, 2] : vector<1x1x512xf32> to vector<1xf32>
    %21 = vector.shape_cast %20 : vector<1xf32> to vector<1x1x1xf32>
    %22 = vector.extract %21[0, 0, 0] : f32 from vector<1x1x1xf32>
    %23 = tpu.iota {dimensions = array<i32: 0>} : vector<8x128xi32>
    %24 = tpu.iota {dimensions = array<i32: 1>} : vector<8x128xi32>
    %c0_i32 = arith.constant 0 : i32
    %25 = vector.broadcast %c0_i32 : i32 to vector<8x128xi32>
    %26 = arith.cmpi eq, %23, %25 : vector<8x128xi32>
    %c0_i32_10 = arith.constant 0 : i32
    %27 = vector.broadcast %c0_i32_10 : i32 to vector<8x128xi32>
    %28 = arith.cmpi eq, %24, %27 : vector<8x128xi32>
    %29 = arith.andi %26, %28 : vector<8x128xi1>
    %cst_11 = arith.constant 0.000000e+00 : f32
    %30 = vector.broadcast %22 : f32 to vector<8x128xf32>
    %31 = vector.broadcast %cst_11 : f32 to vector<8x128xf32>
    %32 = arith.select %29, %30, %31 : vector<8x128xi1>, vector<8x128xf32>
    %c0_12 = arith.constant 0 : index
    %c0_13 = arith.constant 0 : index
    %33 = vector.load %arg4[%c0_12, %c0_13] : memref<8x128xf32, #tpu.memory_space<vmem>>, vector<8x128xf32>
    tpu.vector_store %arg4[%c0_12, %c0_13], %32 {strides = array<i32>} : memref<8x128xf32, #tpu.memory_space<vmem>>, vector<8x128xf32>,
    return
  }
  func.func @transform_0(%arg0: i32) -> (i32, i32) {
    %c0_i32 = arith.constant 0 : i32
    %c0_i32_0 = arith.constant 0 : i32
    return %c0_i32, %arg0 : i32, i32
  }
  func.func @transform_1(%arg0: i32) -> (i32, i32) {
    %c0_i32 = arith.constant 0 : i32
    %c0_i32_0 = arith.constant 0 : i32
    return %c0_i32, %arg0 : i32, i32
  }
  func.func @transform_2(%arg0: i32) -> (i32, i32) {
    %c0_i32 = arith.constant 0 : i32
    %c0_i32_0 = arith.constant 0 : i32
    return %c0_i32, %arg0 : i32, i32
  }
  func.func @transform_3(%arg0: i32) -> (i32, i32) {
    %c0_i32 = arith.constant 0 : i32
    %c0_i32_0 = arith.constant 0 : i32
    return %arg0, %c0_i32 : i32, i32
  }
}

</mosaic_0001>

<bundles_post_ra>
// kernel: skipgram_hs_forward.1
= control target key start
LH: loop header
LB: loop body
LE: loop exit
PB: predicated region body
PF: predicated region fallthrough
CT: control target
= control target key end

     0   :  { %s681_s12 = smov 0   ;;  %s683_s13 = smov 0   ;;  %s798_s0 = inlined_call_operand.vmem [shape: f32[32,1536], index: 0, kind: input, shape index: {}]   ;;  %s799_s1 = inlined_call_operand.vmem [shape: f32[32,1536], index: 1, kind: input, shape index: {}]   ;;  %s800_s2 = inlined_call_operand.vmem [shape: f32[1,1536], index: 2, kind: input, shape index: {}]   ;;  %s801_s3 = inlined_call_operand.vmem [shape: f32[24,128], index: 3, kind: output, shape index: {}]  }
   0x1   :  { %s685_s14 = smov 0  }
   0x2 LB: > { %s697_s15 = sadd.s32 4294967295, %s658_s14   ;;  %s700_s16 = sadd.s32 1, %s658_s14   ;;  %s658_s14 = sphi %s685_s14, %s805_s14   ;;  %s654_s13 = sphi %s683_s13, %s804_s13   ;;  %s650_s12 = sphi %s681_s12, %s803_s12  }
   0x3   : > { %s17_s17 = ssub.s32 %s658_s14, %s700_s16  ;;  %s20_s18 = sadd.s32 1, %s654_s13 }
   0x4   : > { %p18_p0 = scmp.eq.s32.totalorder %s17_s17, 0  ;;  %p27_p1 = scmp.ne.s32.totalorder %s654_s13, %s650_s12 }
   0x5   : > { %p28_p2 = scmp.eq.s32.totalorder %s658_s14, 0  ;;  %p585_p4 = scmp.ge.s32.totalorder %s658_s14, 3 }
   0x6   : > { %s709_s19 = scalar_select %p18_p0, %s654_s13, %s20_s18  }
   0x7   : > { %p711_p3 = por %p28_p2, %p27_p1  ;;  %131 = sbr.rel (%p585_p4) target bundleno = 36 (0x24), region = 16 }
   0xc   : > { %134 = sbr.rel (!%p711_p3) target bundleno = 24 (0x18), region = 20  ;;  %s136_s21 = sand.u32 (%p711_p3), 1, %s654_s13  }
   0xd   : > { %s603_s22 = sshll.u32 (%p711_p3), %s658_s14, 5  ;;  %s586_s23 = sshll.u32 (%p711_p3), %s136_s21, 7 }
   0xe   : > { %s723_s26 = scalar_lea.vmem (%p711_p3), %s798_s0, %s603_s22  ;;  %s138_s27 = scalar_lea.vmem (%p711_p3), [#allocation2], %s586_s23 }
   0xf   : > { %v154_v0 = vld [vmem:[%s723_s26] sm:$0xff] (%p711_p3)  ;;  %v156_v1 = vld [vmem:[%s723_s26 + $0x8] sm:$0xff] (%p711_p3)  ;;  %v158_v2 = vld [vmem:[%s723_s26 + $0x10] sm:$0xff] (%p711_p3) }
  0x10   : > { %155 = vst [vmem:[%s138_s27] sm:$0xff] (%p711_p3), %v154_v0  ;;  %157 = vst [vmem:[%s138_s27 + $0x8] sm:$0xff] (%p711_p3), %v156_v1  ;;  %v160_v3 = vld [vmem:[%s723_s26 + $0x18] sm:$0xff] (%p711_p3)  ;;  %v162_v4 = vld [vmem:[%s723_s26 + $0x60] sm:$0xff] (%p711_p3) }
  0x11   : > { %159 = vst [vmem:[%s138_s27 + $0x10] sm:$0xff] %v158_v2  ;;  %v164_v5 = vld [vmem:[%s723_s26 + $0x68] sm:$0xff]  ;;  %161 = vst [vmem:[%s138_s27 + $0x18] sm:$0xff] %v160_v3  ;;  %v166_v6 = vld [vmem:[%s723_s26 + $0x70] sm:$0xff] }
  0x12   : > { %163 = vst [vmem:[%s138_s27 + $0x20] sm:$0xff] %v162_v4  ;;  %165 = vst [vmem:[%s138_s27 + $0x28] sm:$0xff] %v164_v5  ;;  %v168_v7 = vld [vmem:[%s723_s26 + $0x78] sm:$0xff]  ;;  %v170_v8 = vld [vmem:[%s723_s26 + $0xc0] sm:$0xff] }
  0x13   : > { %167 = vst [vmem:[%s138_s27 + $0x30] sm:$0xff] %v166_v6  ;;  %169 = vst [vmem:[%s138_s27 + $0x38] sm:$0xff] %v168_v7  ;;  %v172_v9 = vld [vmem:[%s723_s26 + $0xc8] sm:$0xff]  ;;  %v174_v10 = vld [vmem:[%s723_s26 + $0xd0] sm:$0xff] }
  0x14   : > { %171 = vst [vmem:[%s138_s27 + $0x40] sm:$0xff] %v170_v8  ;;  %v176_v11 = vld [vmem:[%s723_s26 + $0xd8] sm:$0xff]  ;;  %173 = vst [vmem:[%s138_s27 + $0x48] sm:$0xff] %v172_v9  ;;  %v178_v12 = vld [vmem:[%s723_s26 + $0x120] sm:$0xff] }
  0x15   : > { %175 = vst [vmem:[%s138_s27 + $0x50] sm:$0xff] %v174_v10  ;;  %177 = vst [vmem:[%s138_s27 + $0x58] sm:$0xff] %v176_v11  ;;  %v180_v13 = vld [vmem:[%s723_s26 + $0x128] sm:$0xff]  ;;  %v182_v14 = vld [vmem:[%s723_s26 + $0x130] sm:$0xff] }
  0x16   : > { %179 = vst [vmem:[%s138_s27 + $0x60] sm:$0xff] %v178_v12  ;;  %181 = vst [vmem:[%s138_s27 + $0x68] sm:$0xff] %v180_v13  ;;  %v184_v15 = vld [vmem:[%s723_s26 + $0x138] sm:$0xff] }
  0x17   : > { %183 = vst [vmem:[%s138_s27 + $0x70] sm:$0xff] %v182_v14  ;;  %185 = vst [vmem:[%s138_s27 + $0x78] sm:$0xff] %v184_v15 }
  0x18 PF: > { %191 = sbr.rel (!%p711_p3) target bundleno = 36 (0x24), region = 43  ;;  %s193_s28 = sand.u32 (%p711_p3), 1, %s654_s13  }
  0x19   : > { %s604_s29 = sshll.u32 (%p711_p3), %s658_s14, 5  ;;  %s589_s30 = sshll.u32 (%p711_p3), %s193_s28, 7 }
  0x1a   : > { %s748_s6 = scalar_lea.vmem (%p711_p3), %s799_s1, %s604_s29  ;;  %s195_s7 = scalar_lea.vmem (%p711_p3), [#allocation3], %s589_s30 }
  0x1b   : > { %v211_v16 = vld [vmem:[%s748_s6] sm:$0xff] (%p711_p3)  ;;  %v213_v17 = vld [vmem:[%s748_s6 + $0x8] sm:$0xff] (%p711_p3)  ;;  %v215_v18 = vld [vmem:[%s748_s6 + $0x10] sm:$0xff] (%p711_p3) }
  0x1c   : > { %212 = vst [vmem:[%s195_s7] sm:$0xff] (%p711_p3), %v211_v16  ;;  %214 = vst [vmem:[%s195_s7 + $0x8] sm:$0xff] (%p711_p3), %v213_v17  ;;  %v217_v19 = vld [vmem:[%s748_s6 + $0x18] sm:$0xff] (%p711_p3)  ;;  %v219_v20 = vld [vmem:[%s748_s6 + $0x60] sm:$0xff] (%p711_p3) }
  0x1d   : > { %216 = vst [vmem:[%s195_s7 + $0x10] sm:$0xff] %v215_v18  ;;  %v221_v21 = vld [vmem:[%s748_s6 + $0x68] sm:$0xff]  ;;  %218 = vst [vmem:[%s195_s7 + $0x18] sm:$0xff] %v217_v19  ;;  %v223_v22 = vld [vmem:[%s748_s6 + $0x70] sm:$0xff] }
  0x1e   : > { %220 = vst [vmem:[%s195_s7 + $0x20] sm:$0xff] %v219_v20  ;;  %222 = vst [vmem:[%s195_s7 + $0x28] sm:$0xff] %v221_v21  ;;  %v225_v23 = vld [vmem:[%s748_s6 + $0x78] sm:$0xff]  ;;  %v227_v24 = vld [vmem:[%s748_s6 + $0xc0] sm:$0xff] }
  0x1f   : > { %224 = vst [vmem:[%s195_s7 + $0x30] sm:$0xff] %v223_v22  ;;  %226 = vst [vmem:[%s195_s7 + $0x38] sm:$0xff] %v225_v23  ;;  %v229_v25 = vld [vmem:[%s748_s6 + $0xc8] sm:$0xff]  ;;  %v231_v26 = vld [vmem:[%s748_s6 + $0xd0] sm:$0xff] }
  0x20   : > { %228 = vst [vmem:[%s195_s7 + $0x40] sm:$0xff] %v227_v24  ;;  %v233_v27 = vld [vmem:[%s748_s6 + $0xd8] sm:$0xff]  ;;  %230 = vst [vmem:[%s195_s7 + $0x48] sm:$0xff] %v229_v25  ;;  %v235_v28 = vld [vmem:[%s748_s6 + $0x120] sm:$0xff] }
  0x21   : > { %232 = vst [vmem:[%s195_s7 + $0x50] sm:$0xff] %v231_v26  ;;  %234 = vst [vmem:[%s195_s7 + $0x58] sm:$0xff] %v233_v27  ;;  %v237_v29 = vld [vmem:[%s748_s6 + $0x128] sm:$0xff]  ;;  %v239_v30 = vld [vmem:[%s748_s6 + $0x130] sm:$0xff] }
  0x22   : > { %236 = vst [vmem:[%s195_s7 + $0x60] sm:$0xff] %v235_v28  ;;  %238 = vst [vmem:[%s195_s7 + $0x68] sm:$0xff] %v237_v29  ;;  %v241_v31 = vld [vmem:[%s748_s6 + $0x138] sm:$0xff] }
  0x23   : > { %240 = vst [vmem:[%s195_s7 + $0x70] sm:$0xff] %v239_v30  ;;  %242 = vst [vmem:[%s195_s7 + $0x78] sm:$0xff] %v241_v31 }
  0x24 PF: > { %p592_p5 = scmp.ge.s32.totalorder %s658_s14, 1  ;;  %p255_p6 = scmp.lt.s32.totalorder %s658_s14, 4 }
  0x26   : > { %p256_p7 = pnand %p592_p5, %p255_p6 }
  0x27   : > { %s262_s8 = sand.u32 (!%p256_p7), 1, %s650_s12   ;;  %s595_s12 = sshll.u32 (!%p256_p7), %s697_s15, 2 }
  0x28   : > { %259 = sbr.rel (%p256_p7) target bundleno = 340 (0x154), region = 70  ;;  %s593_s9 = sshll.u32 (!%p256_p7), %s262_s8, 7 }
  0x29   : > { %s264_s10 = scalar_lea.vmem (!%p256_p7), [#allocation2], %s593_s9  ;;  %s271_s11 = scalar_lea.vmem (!%p256_p7), [#allocation3], %s593_s9 }
  0x2a   : > { %p302_p8 = scmp.lt.s32.totalorder (!%p256_p7), %s595_s12, 11  ;;  %p306_p9 = scmp.lt.s32.totalorder (!%p256_p7), %s697_s15, 2 }
  0x2d   : > { %v310_v32 = vld [vmem:[%s264_s10] sm:$0xff]  ;;  %v311_v33 = vld [vmem:[%s264_s10 + $0x8] sm:$0xff]  ;;  %v312_v34 = vld [vmem:[%s264_s10 + $0x10] sm:$0xff]  ;;  %s807_s12 = smov (!%p302_p8, %s595_s12), 11  ;;  %vm469_vm1 = vcmask 1040384   ;;  %s809_s15 = smov (!%p306_p9, %s697_s15), 2 }
  0x2e   : > { %v314_v35 = vld [vmem:[%s264_s10 + $0x20] sm:$0xff]  ;;  %v313_v36 = vld [vmem:[%s264_s10 + $0x18] sm:$0xff]  ;;  %v315_v37 = vld [vmem:[%s264_s10 + $0x28] sm:$0xff]  ;;  %s304_s18 = scalar_lea.vmem %s800_s2, %s807_s12  ;;  %s596_s20 = sshll.u32 %s809_s15, 3 }
  0x2f   : > { %v316_v38 = vld [vmem:[%s264_s10 + $0x30] sm:$0xff]  ;;  %v317_v39 = vld [vmem:[%s264_s10 + $0x38] sm:$0xff]  ;;  %v318_v40 = vld [vmem:[%s264_s10 + $0x40] sm:$0xff]  ;;  %s309_s23 = scalar_lea.vmem %s801_s3, %s596_s20 }
  0x30   : > { %v319_v41 = vld [vmem:[%s264_s10 + $0x48] sm:$0xff]  ;;  %v320_v42 = vld [vmem:[%s264_s10 + $0x50] sm:$0xff]  ;;  %v321_v43 = vld [vmem:[%s264_s10 + $0x58] sm:$0xff] }
  0x31   : > { %v322_v44 = vld [vmem:[%s264_s10 + $0x60] sm:$0xff]  ;;  %v323_v45 = vld [vmem:[%s264_s10 + $0x68] sm:$0xff]  ;;  %v324_v48 = vld [vmem:[%s264_s10 + $0x70] sm:$0xff] }
  0x32   : > { %v326_v46 = vld [vmem:[%s271_s11] sm:$0xff]  ;;  %v327_v47 = vld [vmem:[%s271_s11 + $0x8] sm:$0xff]  ;;  %v328_v49 = vld [vmem:[%s271_s11 + $0x10] sm:$0xff] }
  0x33   : > { %v329_v50 = vld [vmem:[%s271_s11 + $0x18] sm:$0xff]  ;;  %v330_v51 = vld [vmem:[%s271_s11 + $0x20] sm:$0xff]  ;;  %v342_v52 = vmul.f32 %v326_v46, %v310_v32  ;;  %v343_v53 = vmul.f32 %v327_v47, %v311_v33  ;;  %v331_v55 = vld [vmem:[%s271_s11 + $0x28] sm:$0xff]  ;;  %v344_v58 = vmul.f32 %v328_v49, %v312_v34 }
  0x34   : > { %v325_v54 = vld [vmem:[%s264_s10 + $0x78] sm:$0xff]  ;;  %v332_v56 = vld [vmem:[%s271_s11 + $0x30] sm:$0xff]  ;;  %v346_v59 = vmul.f32 %v330_v51, %v314_v35  ;;  %v334_v60 = vld [vmem:[%s271_s11 + $0x40] sm:$0xff]  ;;  %v345_v63 = vmul.f32 %v329_v50, %v313_v36  ;;  %v347_v0 = vmul.f32 %v331_v55, %v315_v37 }
  0x35   : > { %v333_v57 = vld [vmem:[%s271_s11 + $0x38] sm:$0xff]  ;;  %v335_v61 = vld [vmem:[%s271_s11 + $0x48] sm:$0xff]  ;;  %v336_v62 = vld [vmem:[%s271_s11 + $0x50] sm:$0xff]  ;;  %v348_v1 = vmul.f32 %v332_v56, %v316_v38  ;;  %v350_v6 = vmul.f32 %v334_v60, %v318_v40  ;;  %v660_v38 = vmov 1966171168   ;;  %v412_v40 = vlaneseq }
  0x36   : > { %v349_v2 = vmul.f32 %v333_v57, %v317_v39  ;;  %v337_v3 = vld [vmem:[%s271_s11 + $0x58] sm:$0xff]  ;;  %v338_v4 = vld [vmem:[%s271_s11 + $0x60] sm:$0xff]  ;;  %v339_v5 = vld [vmem:[%s271_s11 + $0x68] sm:$0xff]  ;;  %v351_v7 = vmul.f32 %v335_v61, %v319_v41  ;;  %v352_v8 = vmul.f32 %v336_v62, %v320_v42  ;;  %v358_v9 = vadd.f32 %v346_v59, %v342_v52 }
  0x37   : > { %v340_v10 = vld [vmem:[%s271_s11 + $0x70] sm:$0xff]  ;;  %v341_v11 = vld [vmem:[%s271_s11 + $0x78] sm:$0xff]  ;;  %v353_v12 = vmul.f32 %v337_v3, %v321_v43  ;;  %v354_v13 = vmul.f32 %v338_v4, %v322_v44  ;;  %v355_v14 = vmul.f32 %v339_v5, %v323_v45  ;;  %v367_v15 = vadd.f32 %v347_v0, %v343_v53  ;;  %v402_v3 = vld [vmem:[%s304_s18] sm:$0xf] }
  0x38   : > { %v356_v16 = vmul.f32 %v340_v10, %v324_v48  ;;  %v359_v17 = vadd.f32 %v358_v9, %v350_v6  ;;  %v376_v18 = vadd.f32 %v348_v1, %v344_v58  ;;  %v357_v19 = vmul.f32 %v341_v11, %v325_v54 }
  0x39   : > { %v368_v20 = vadd.f32 %v367_v15, %v351_v7  ;;  %v385_v21 = vadd.f32 %v349_v2, %v345_v63  ;;  %v410_v39 = vunpack.c.l.s4 %v660_v38  ;;  %v771_v50 = vshrl.u32 %v412_v40, 7 }
  0x3a   : > { %v360_v22 = vadd.f32 %v359_v17, %v354_v13  ;;  %v377_v23 = vadd.f32 %v376_v18, %v352_v8 }
  0x3b   : > { %v369_v24 = vadd.f32 %v368_v20, %v355_v14  ;;  %v386_v25 = vadd.f32 %v385_v21, %v353_v12  ;;  %v411_v49 = vunpack.c.0.s8 %v410_v39  ;;  %v451_v18 = vsub.s32 0, %v771_v50 }
  0x3c   : > { %v361_v26 = vrot.slane %v360_v22, 4  ;;  %v378_v27 = vadd.f32 %v377_v23, %v356_v16  ;;  %v446_v16 = vand.u32 2147483647, %v402_v3  ;;  %v455_v20 = vsub.s32 1, %v771_v50 }
  0x3d   : > { %v370_v28 = vrot.slane %v369_v24, 4  ;;  %v387_v29 = vadd.f32 %v386_v25, %v357_v19  ;;  %v414_v59 = vsub.s32 %v411_v49, %v771_v50  ;;  %v459_v21 = vsub.s32 2, %v771_v50 }
  0x3e   : > { %v362_v30 = vadd.f32 %v361_v26, %v360_v22  ;;  %v379_v31 = vrot.slane %v378_v27, 4  ;;  %v463_v22 = vsub.s32 3, %v771_v50  ;;  %vm490_vm2 = vcmp.eq.s32.totalorder %v771_v50, 0 }
  0x3f   : > { %v371_v32 = vadd.f32 %v370_v28, %v369_v24  ;;  %v388_v33 = vrot.slane %v387_v29, 4 }
  0x40   : > { %v363_v34 = vrot.slane %v362_v30, 2  ;;  %v380_v35 = vadd.f32 %v379_v31, %v378_v27 }
  0x41   : > { %v372_v36 = vrot.slane %v371_v32, 2  ;;  %v389_v37 = vadd.f32 %v388_v33, %v387_v29 }
  0x42   : > { %v364_v41 = vadd.f32 %v363_v34, %v362_v30  ;;  %v381_v42 = vrot.slane %v380_v35, 2 }
  0x43   : > { %v373_v43 = vadd.f32 %v372_v36, %v371_v32  ;;  %v390_v44 = vrot.slane %v389_v37, 2 }
  0x44   : > { %v365_v45 = vrot.slane %v364_v41, 1  ;;  %v382_v46 = vadd.f32 %v381_v42, %v380_v35 }
  0x45   : > { %v374_v47 = vrot.slane %v373_v43, 1  ;;  %v391_v48 = vadd.f32 %v390_v44, %v389_v37 }
  0x46   : > { %v366_v51 = vadd.f32 %v365_v45, %v364_v41  ;;  %v383_v52 = vrot.slane %v382_v46, 1 }
  0x47   : > { %v375_v53 = vadd.f32 %v374_v47, %v373_v43  ;;  %v392_v54 = vrot.slane %v391_v48, 1  ;;  %v489_v43 = vand.u32 127, %v412_v40 }
  0x48   : > { %v384_v55 = vadd.f32 %v383_v52, %v382_v46  ;;  %v597_v56 = vclamps-f32 %v366_v51, 10.0 }
  0x49   : > { %v393_v57 = vadd.f32 %v392_v54, %v391_v48  ;;  %v598_v58 = vclamps-f32 %v375_v53, 10.0  ;;  %vm491_vm3 = vcmp.eq.s32.totalorder %v489_v43, 0 }
  0x4a   : > { %v599_v60 = vclamps-f32 %v384_v55, 10.0  ;;  %vm492_vm4 = vmand %vm490_vm2, %vm491_vm3 }
  0x4b   : > { %v600_v61 = vclamps-f32 %v393_v57, 10.0  ;;  %v407_v62 = vcombine.low %v597_v56, %v598_v58 }
  0x4d   : > { %v408_v63 = vcombine.low %v599_v60, %v600_v61  ;;  %v415_v0 = vrot.slane %v407_v62, %v414_v59 }
  0x4f   : > { %v422_v1 = vrot.slane %v408_v63, %v414_v59 }
  0x51   : > { %v423_v2 = vcombine.low %v415_v0, %v422_v1 }
  0x53   : > { %v430_v4 = vrot.slane %v423_v2, %v414_v59 }
  0x55   : > { %v432_v5 = vmul.f32 %v430_v4, %v402_v3 }
  0x57   : > { %v433_v6 = vsub.f32 0.0, %v432_v5 }
  0x59   : > { %v434_v7 = vmul.f32 1.442695, %v433_v6 }
  0x5b   : > { %632 = vpow2.f32 %v434_v7 }
  0x68   : > { %v633_v8 = vpop.eup %632 }
  0x69   : > { %v436_v9 = vadd.f32 1.0, %v633_v8  ;;  %v439_v10 = vmul.f32 -0.5, %v633_v8  ;;  %v442_v12 = vand.u32 2147483647, %v633_v8 }
  0x6b   : > { %634 = vlog2.f32 %v436_v9  ;;  %v440_v11 = vadd.f32 1.0, %v439_v10  ;;  %vm443_vm0 = vcmp.lt.f32.partialorder %v442_v12, 0.0004427343 }
  0x6d   : > { %v441_v13 = vmul.f32 %v633_v8, %v440_v11 }
  0x78   : > { %v635_v14 = vpop.eup %634 }
  0x79   : > { %v438_v15 = vmul.f32 0.6931472, %v635_v14 }
  0x7b   : > { %v444_v17 = vsel %vm443_vm0, %v441_v13, %v438_v15 }
  0x7c   : > { %v445_v19 = vsub.f32 0.0, %v444_v17 }
  0x7e   : > { %v447_v23 = vmul.f32 %v446_v16, %v445_v19 }
  0x80   : > { %v452_v24 = vrot.slane %v447_v23, %v451_v18  ;;  %v456_v25 = vrot.slane %v447_v23, %v455_v20  ;;  %v460_v26 = vrot.slane %v447_v23, %v459_v21  ;;  %v464_v27 = vrot.slane %v447_v23, %v463_v22 }
  0x82   : > { %v470_v28 = vsel %vm469_vm1, %v452_v24, 0.0  ;;  %v471_v29 = vsel %vm469_vm1, %v456_v25, 0.0  ;;  %v473_v30 = vsel %vm469_vm1, %v460_v26, 0.0  ;;  %v475_v32 = vsel %vm469_vm1, %v464_v27, 0.0 }
  0x83   : > { %v472_v31 = vadd.f32 %v471_v29, %v470_v28 }
  0x85   : > { %v474_v33 = vadd.f32 %v473_v30, %v472_v31 }
  0x87   : > { %v476_v34 = vadd.f32 %v475_v32, %v474_v33 }
  0x89   : > { %477 = vadd.xlane.f32.xlu0 %v476_v34 }
 0x112   : > { %v478_v35 = vpop.xlane.xlu0 %477 }
 0x113   : > { %v479_v36 = vrot.slane %v478_v35, 4 }
 0x115   : > { %v480_v37 = vadd.f32 %v479_v36, %v478_v35 }
 0x117   : > { %v481_v38 = vrot.slane %v480_v37, 2 }
 0x119   : > { %v482_v39 = vadd.f32 %v481_v38, %v480_v37 }
 0x11b   : > { %v483_v41 = vrot.slane %v482_v39, 1 }
 0x11d   : > { %v484_v42 = vadd.f32 %v483_v41, %v482_v39 }
 0x11f   : > { %605 = vpush %v484_v42 }
 0x150   : > { %s606_s24 = spop %605 }
 0x151   : > { %v493_v44 = vstv %s606_s24 }
 0x152   : > { %v494_v45 = vsel %vm492_vm4, %v493_v44, 0.0 }
 0x153   : > { %495 = vst [vmem:[%s309_s23] sm:$0xff] %v494_v45 }
 0x154 PF: > { %p10_p10 = scmp.ge.s32.totalorder %s700_s16, 5   ;;  %s803_s12 = smov %s654_s13 }
 0x155   : > { %s804_s13 = smov %s709_s19  ;;  %s805_s14 = smov %s700_s16 }
 0x156   :  { %12 = sbr.rel (!%p10_p10) target bundleno = 2 (0x2), region = 124 }

</bundles_post_ra>
